<compile_context>
chip_gen: v5e
topology: v5e:2x2
jax: 0.10.0
libtpu: 0.0.40
codegen_flags: <defaults>
</compile_context>

<pallas_src>
import functools

import jax
import jax.numpy as jnp
from jax.experimental import pallas as pl
from jax.experimental.pallas import tpu as pltpu


def _round_up(x, m):
    return (x + m - 1) // m * m


# ---------- phase 1: conv matmul (C-major) + per-channel sum / sum-of-squares ----------
def _stats_kernel(p_ref, w_ref, stats_ref):
    # (C8, K) @ (K, TM) -> (C8, TM); bf16 operands, f32 accumulation on the MXU.
    acc = jnp.dot(w_ref[...], p_ref[...], preferred_element_type=jnp.float32)

    # stats block is grid-resident across the inner ("arbitrary") axis,
    # one partial block per core (outer "parallel" axis) -> no write race.
    @pl.when(pl.program_id(1) == 0)
    def _():
        stats_ref[...] = jnp.zeros_like(stats_ref)

    # Two separate sliced writes instead of a concatenate.
    stats_ref[:, 0:1] = stats_ref[:, 0:1] + jnp.sum(acc, axis=1, keepdims=True)
    stats_ref[:, 1:2] = stats_ref[:, 1:2] + jnp.sum(acc * acc, axis=1, keepdims=True)


# ---------- phase 2: recompute conv matmul, batch-norm normalize + ReLU ----------
def _bn_relu_kernel(p_ref, w_ref, stats_ref, gamma_ref, beta_ref, o_ref, *, eps, inv_m):
    acc = jnp.dot(w_ref[...], p_ref[...], preferred_element_type=jnp.float32)  # (C8, TM)
    st = stats_ref[...]                       # (C8, 2) f32: [sum | sumsq]
    mean = st[:, 0:1] * inv_m                 # (C8, 1)
    ex2 = st[:, 1:2] * inv_m
    var = jnp.maximum(ex2 - mean * mean, 0.0)
    inv = jax.lax.rsqrt(var + eps)            # EUP slot
    scale = gamma_ref[...] * inv              # (C8, 1)
    shift = beta_ref[...] - mean * scale      # (C8, 1)
    y = acc * scale + shift                   # broadcast per-channel affine over lanes
    o_ref[...] = jnp.maximum(y, 0.0).astype(o_ref.dtype)


def conv_bn_relu(x_nchw, w_oikk, gamma, beta, *, stride=1, eps=1e-5,
                 block_m=2048, n_cores=2):
    """Forward of the PyTorch `convolution` module (with_bn=True, training mode)."""
    N, Cin, H, W = x_nchw.shape
    Cout, Cin_w, kh, kw = w_oikk.shape
    assert Cin == Cin_w and kh == kw, "weight/input channel or kernel mismatch"
    k = kh
    pad = (k - 1) // 2
    Ho = (H + 2 * pad - k) // stride + 1
    Wo = (W + 2 * pad - k) // stride + 1

    M = N * Ho * Wo
    K = k * k * Cin                 # contraction dim, NOT padded in HBM
    C8 = _round_up(Cout, 8)         # sublane-aligned C-major output rows

    # Lane-dense tile along M (multiple of 128).  Cap TM so the double-buffered
    # PT (bf16) + output (f32) tiles stay well under the default scoped VMEM
    # limit even for large K (matters on v7x's 64 MiB physical VMEM).
    per_row = 2 * K * 2 + 2 * C8 * 4
    tm_cap = max(128, ((20 << 20) // per_row) // 128 * 128)
    TM = max(128, min(_round_up(block_m, 128),
                      _round_up(-(-M // n_cores), 128),
                      tm_cap))
    Mp = _round_up(M, n_cores * TM)
    tiles_per_core = Mp // (n_cores * TM)
    n_tiles = Mp // TM

    # ---- glue: transposed im2col PT (K, Mp) bf16; pure layout, no arithmetic ----
    x_nhwc = jnp.transpose(x_nchw, (0, 2, 3, 1)).astype(jnp.bfloat16)
    xpad = jnp.pad(x_nhwc, ((0, 0), (pad, pad), (pad, pad), (0, 0)))
    taps = []
    for ih in range(k):
        for iw in range(k):
            taps.append(
                xpad[:, ih:ih + (Ho - 1) * stride + 1:stride,
                        iw:iw + (Wo - 1) * stride + 1:stride, :])
    # (k*k, N, Ho, Wo, Cin) -> (k*k, Cin, N, Ho, Wo) -> (K, M); row = tap*Cin + cin
    PT = jnp.stack(taps, axis=0).transpose(0, 4, 1, 2, 3).reshape(K, M)
    PT = jnp.pad(PT, ((0, 0), (0, Mp - M)))      # zero columns: inert for stats

    # PyTorch weight (Cout, Cin, kh, kw) -> (Cout, kh, kw, Cin) -> (Cout, K), rows padded to C8
    WT = jnp.transpose(w_oikk, (0, 2, 3, 1)).reshape(Cout, K).astype(jnp.float32)
    WT = jnp.pad(WT, ((0, C8 - Cout), (0, 0))).astype(jnp.bfloat16)
    gamma_p = jnp.pad(gamma.astype(jnp.float32).reshape(Cout, 1), ((0, C8 - Cout), (0, 0)))
    beta_p = jnp.pad(beta.astype(jnp.float32).reshape(Cout, 1), ((0, C8 - Cout), (0, 0)))

    # ---- phase 1: per-channel sum / sumsq, split across TensorCores ----
    part_stats = pl.pallas_call(
        _stats_kernel,
        out_shape=jax.ShapeDtypeStruct((n_cores * C8, 2), jnp.float32),
        grid=(n_cores, tiles_per_core),
        in_specs=[
            pl.BlockSpec((K, TM), lambda c, i: (0, c * tiles_per_core + i)),
            pl.BlockSpec((C8, K), lambda c, i: (0, 0)),        # weights resident
        ],
        out_specs=pl.BlockSpec((C8, 2), lambda c, i: (c, 0)),  # per-core partial stats
        compiler_params=pltpu.CompilerParams(
            dimension_semantics=("parallel", "arbitrary")),
    )(PT, WT)
    stats = part_stats.reshape(n_cores, C8, 2).sum(axis=0)     # tiny XLA reduce

    # ---- phase 2: recompute matmul + BN + ReLU, lane-dense C-major output ----
    kernel2 = functools.partial(_bn_relu_kernel, eps=eps, inv_m=1.0 / M)
    out_cm = pl.pallas_call(
        kernel2,
        out_shape=jax.ShapeDtypeStruct((C8, Mp), jnp.float32),
        grid=(n_tiles,),
        in_specs=[
            pl.BlockSpec((K, TM), lambda i: (0, i)),
            pl.BlockSpec((C8, K), lambda i: (0, 0)),           # weights resident
            pl.BlockSpec((C8, 2), lambda i: (0, 0)),           # stats resident
            pl.BlockSpec((C8, 1), lambda i: (0, 0)),           # gamma resident
            pl.BlockSpec((C8, 1), lambda i: (0, 0)),           # beta resident
        ],
        out_specs=pl.BlockSpec((C8, TM), lambda i: (0, i)),
        compiler_params=pltpu.CompilerParams(
            dimension_semantics=("parallel",)),                # both TCs on v7x
    )(PT, WT, stats, gamma_p, beta_p)

    # cheap epilogue: slice away padding, leading-dim swap back to NCHW
    return out_cm[:Cout, :M].reshape(Cout, N, Ho, Wo).transpose(1, 0, 2, 3)


def _reference(x, w, gamma, beta, *, stride, eps=1e-5):
    """Plain-JAX f32 reference: nn.Conv2d(bias=False) + BatchNorm2d(train) + ReLU."""
    k = w.shape[-1]
    pad = (k - 1) // 2
    conv = jax.lax.conv_general_dilated(
        x.astype(jnp.float32), w.astype(jnp.float32),
        window_strides=(stride, stride),
        padding=((pad, pad), (pad, pad)),
        dimension_numbers=("NCHW", "OIHW", "NCHW"),
    )
    mean = conv.mean(axis=(0, 2, 3), keepdims=True)
    var = jnp.mean(jnp.square(conv - mean), axis=(0, 2, 3), keepdims=True)
    y = (conv - mean) * jax.lax.rsqrt(var + eps) * gamma.reshape(1, -1, 1, 1) \
        + beta.reshape(1, -1, 1, 1)
    return jnp.maximum(y, 0.0)


if __name__ == "__main__":
    # Module config: convolution(k=3, inp_dim=4, out_dim=8, stride=1, with_bn=True)
    k, inp_dim, out_dim, stride = 3, 4, 8, 1
    N, H, W = 2, 16, 16

    key = jax.random.PRNGKey(0)
    kx, kw_, kg, kb = jax.random.split(key, 4)
    x = jax.random.normal(kx, (N, inp_dim, H, W), dtype=jnp.float32)
    w = 0.1 * jax.random.normal(kw_, (out_dim, inp_dim, k, k), dtype=jnp.float32)
    gamma = 1.0 + 0.05 * jax.random.normal(kg, (out_dim,), dtype=jnp.float32)
    beta = 0.05 * jax.random.normal(kb, (out_dim,), dtype=jnp.float32)

    # block_m=128 so the toy shape (M = 512 output pixels) exercises a multi-step
    # grid, the cross-tile stats accumulation, and the 2-core phase-1 split.
    out = conv_bn_relu(x, w, gamma, beta, stride=stride, block_m=128)
    out = jax.block_until_ready(out)

    ref = _reference(x, w, gamma, beta, stride=stride)
    assert out.shape == ref.shape == (N, out_dim, H, W)
    # Tolerance relaxed vs the f32 reference because conv operands run in bf16
    # on the MXU (f32 accumulation); BN math is f32.
    max_err = float(jnp.max(jnp.abs(out - ref)))
    assert jnp.allclose(out, ref, atol=3e-2, rtol=3e-2), f"max abs err {max_err}"

    print("KERNEL_OK")
</pallas_src>

<mosaic_0001>
module attributes {stable_mosaic.version = 11 : i64} {
  func.func @_stats_kernel(%arg0: i32, %arg1: i32, %arg2: memref<36x128xbf16, #tpu.memory_space<vmem>>, %arg3: memref<8x36xbf16, #tpu.memory_space<vmem>>, %arg4: memref<8x2xf32, #tpu.memory_space<vmem>>) attributes {dimension_semantics = [#tpu.dimension_semantics<parallel>, #tpu.dimension_semantics<arbitrary>], iteration_bounds = array<i64: 2, 2>, scalar_prefetch = 0 : i64, scratch_operands = 0 : i64, tpu.core_type = #tpu.core_type<tc>, window_params = [{transform_indices = @transform_0, window_bounds = array<i64: 36, 128>}, {pipeline_mode = #tpu.pipeline_mode<synchronous>, transform_indices = @transform_1, window_bounds = array<i64: 8, 36>}, {transform_indices = @transform_2, window_bounds = array<i64: 8, 2>}]} {
    %c0 = arith.constant 0 : index
    %c0_0 = arith.constant 0 : index
    %0 = vector.load %arg3[%c0, %c0_0] : memref<8x36xbf16, #tpu.memory_space<vmem>>, vector<8x36xbf16>
    %c0_1 = arith.constant 0 : index
    %c0_2 = arith.constant 0 : index
    %1 = vector.load %arg2[%c0_1, %c0_2] : memref<36x128xbf16, #tpu.memory_space<vmem>>, vector<36x128xbf16>
    %cst = arith.constant dense<0.000000e+00> : vector<8x128xf32>
    %2 = tpu.matmul %0, %1, %cst {dimension_numbers = #tpu.dot_dimension_numbers<[1], [0], [0], [1], [0, 0, 1, 1], [], []>} : vector<8x36xbf16>, vector<36x128xbf16>, vector<8x128xf32> -> vector<8x128xf32>
    %c0_i32 = arith.constant 0 : i32
    %3 = arith.cmpi eq, %arg1, %c0_i32 : i32
    %4 = arith.extui %3 : i1 to i32
    %c0_i32_3 = arith.constant 0 : i32
    %5 = arith.cmpi ne, %4, %c0_i32_3 : i32
    scf.if %5 {
      %cst_13 = arith.constant 0.000000e+00 : f32
      %17 = vector.broadcast %cst_13 : f32 to vector<8x2xf32>
      %c0_14 = arith.constant 0 : index
      %c0_15 = arith.constant 0 : index
      %18 = vector.load %arg4[%c0_14, %c0_15] : memref<8x2xf32, #tpu.memory_space<vmem>>, vector<8x2xf32>
      tpu.vector_store %arg4[%c0_14, %c0_15], %17 {strides = array<i32>} : memref<8x2xf32, #tpu.memory_space<vmem>>, vector<8x2xf32>,
    } else {
    }
    %c0_4 = arith.constant 0 : index
    %c0_5 = arith.constant 0 : index
    %6 = vector.load %arg4[%c0_4, %c0_5] : memref<8x2xf32, #tpu.memory_space<vmem>>, vector<8x1xf32>
    %cst_6 = arith.constant dense<0.000000e+00> : vector<8xf32>
    %7 = vector.multi_reduction <add>, %2, %cst_6 [1] : vector<8x128xf32> to vector<8xf32>
    %8 = vector.shape_cast %7 : vector<8xf32> to vector<8x1xf32>
    %9 = arith.addf %6, %8 : vector<8x1xf32>
    %c0_7 = arith.constant 0 : index
    %c0_8 = arith.constant 0 : index
    %10 = vector.load %arg4[%c0_7, %c0_8] : memref<8x2xf32, #tpu.memory_space<vmem>>, vector<8x1xf32>
    tpu.vector_store %arg4[%c0_7, %c0_8], %9 {strides = array<i32>} : memref<8x2xf32, #tpu.memory_space<vmem>>, vector<8x1xf32>,
    %c0_9 = arith.constant 0 : index
    %c1 = arith.constant 1 : index
    %11 = vector.load %arg4[%c0_9, %c1] : memref<8x2xf32, #tpu.memory_space<vmem>>, vector<8x1xf32>
    %12 = arith.mulf %2, %2 : vector<8x128xf32>
    %cst_10 = arith.constant dense<0.000000e+00> : vector<8xf32>
    %13 = vector.multi_reduction <add>, %12, %cst_10 [1] : vector<8x128xf32> to vector<8xf32>
    %14 = vector.shape_cast %13 : vector<8xf32> to vector<8x1xf32>
    %15 = arith.addf %11, %14 : vector<8x1xf32>
    %c0_11 = arith.constant 0 : index
    %c1_12 = arith.constant 1 : index
    %16 = vector.load %arg4[%c0_11, %c1_12] : memref<8x2xf32, #tpu.memory_space<vmem>>, vector<8x1xf32>
    tpu.vector_store %arg4[%c0_11, %c1_12], %15 {strides = array<i32>} : memref<8x2xf32, #tpu.memory_space<vmem>>, vector<8x1xf32>,
    return
  }
  func.func @transform_0(%arg0: i32, %arg1: i32) -> (i32, i32) {
    %c2_i32 = arith.constant 2 : i32
    %0 = arith.muli %arg0, %c2_i32 : i32
    %1 = arith.addi %0, %arg1 : i32
    %c0_i32 = arith.constant 0 : i32
    %c0_i32_0 = arith.constant 0 : i32
    return %c0_i32, %1 : i32, i32
  }
  func.func @transform_1(%arg0: i32, %arg1: i32) -> (i32, i32) {
    %c0_i32 = arith.constant 0 : i32
    %c0_i32_0 = arith.constant 0 : i32
    %c0_i32_1 = arith.constant 0 : i32
    return %c0_i32, %c0_i32_0 : i32, i32
  }
  func.func @transform_2(%arg0: i32, %arg1: i32) -> (i32, i32) {
    %c0_i32 = arith.constant 0 : i32
    %c0_i32_0 = arith.constant 0 : i32
    return %arg0, %c0_i32 : i32, i32
  }
}

</mosaic_0001>

<bundles_post_ra>
// kernel: tpu_custom_call.1
= control target key start
LH: loop header
LB: loop body
LE: loop exit
PB: predicated region body
PF: predicated region fallthrough
CT: control target
= control target key end

     0   :  { %s762_s0 = inlined_call_operand.hbm [shape: bf16[36,512], index: 0, kind: input, shape index: {}]   ;;  %s763_s1 = inlined_call_operand.hbm [shape: bf16[8,36], index: 1, kind: input, shape index: {}]   ;;  %s764_s2 = inlined_call_operand.vmem [shape: f32[16,2], index: 2, kind: output, shape index: {}]  }
   0x1   :  { %766 = sst [smem:[#allocation9_spill]] %s763_s1 }
   0x2   :  { %7 = vsyncpa [#allocation3], 0 }
   0x3   :  { %9 = vsyncpa [#allocation3 + $0x1], 0 }
   0x4   :  { %10 = vsyncpa [#allocation5], 0  ;;  %s614_s9 = smov 0   ;;  %s616_s10 = smov 0  }
   0x5   :  { %s618_s11 = smov 0   ;;  %s620_s12 = smov 0  }
   0x6   :  { %s622_s13 = smov 0   ;;  %s624_s14 = smov 0  }
   0x7   :  { %s626_s15 = smov 0   ;;  %s628_s16 = smov 0  }
   0x8 LB: > { %767 = sst [smem:[#allocation8_spill]] %s588_s15  ;;  %s348_s17 = sadd.s32 4294967295, %s592_s16   ;;  %s592_s16 = sphi %s628_s16, %s16_s16   ;;  %s588_s15 = sphi %s626_s15, %s780_s15   ;;  %s584_s14 = sphi %s624_s14, %s779_s14   ;;  %s580_s13 = sphi %s622_s13, %s774_s13   ;;  %s576_s12 = sphi %s620_s12, %s778_s12   ;;  %s572_s11 = sphi %s618_s11, %s777_s11   ;;  %s568_s10 = sphi %s616_s10, %s776_s10   ;;  %s564_s9 = sphi %s614_s9, %s775_s9  }
   0x9   : > { %s39_s18 = sadd.s32 1, %s572_s11  ;;  %p46_p0 = scmp.ne.s32.totalorder %s572_s11, %s568_s10 }
   0xa   : > { %p47_p1 = scmp.eq.s32.totalorder %s592_s16, 0  ;;  %p52_p2 = scmp.ne.s32.totalorder %s568_s10, %s564_s9 }
   0xb   : > { %p658_p3 = scmp.eq.s32.totalorder %s348_s17, 0  ;;  %p352_p5 = scmp.ge.s32.totalorder %s592_s16, 1 }
   0xc   : > { %p662_p4 = por %p47_p1, %p46_p0  ;;  %p110_p7 = scmp.lt.s32.totalorder %s592_s16, 5 }
   0xd   : > { %p669_p6 = por %p658_p3, %p52_p2  ;;  %s771_s1 = sld [smem:[#allocation9_spill]] }
   0xe   : > { %p677_p8 = pnand %p352_p5, %p110_p7  ;;  %s594_s26 = smov [#allocation4]  }
   0xf   : > { %s124_s27 = sshll.u32 %s594_s26, 4  ;;  %p391_p10 = scmp.lt.s32.totalorder %s592_s16, 4  ;;  %s125_s27 = int_to_ptr.vmem [resolvable:$true] %s124_s27 }
  0x10   : > { %p382_p9 = pneg %p677_p8  ;;  %s25_s29 = sadd.s32 1, %s584_s14 }
  0x11   : > { %p688_p12 = pnand %p391_p10, %p662_p4  ;;  %s28_s30 = sadd.s32 1, %s588_s15 }
  0x12   : > { %p383_p11 = pnand %p382_p9, %p658_p3  ;;  %p26_p13 = scmp.ge.s32.totalorder %s25_s29, 2 }
  0x13   : > { %s122_s24 = sshll.u32 %s771_s1, 4  ;;  %s350_s3 = sshll.u32 %s588_s15, 1  ;;  %s123_s24 = int_to_ptr.hbm [resolvable:$true] %s122_s24 }
  0x14   : > { %385 = dma.hbm_to_vmem [thread:$0]  (!%p383_p11), %s123_s24, 64, %s125_s27, [#allocation5]  }
  0x15   : > { %s33_s4 = sadd.s32 %s584_s14, %s350_s3  ;;  %s135_s5 = sand.u32 1, %s572_s11  }
  0x16   : > { %s782_s29 = smov (%p26_p13, %s25_s29), 0  ;;  %s784_s30 = smov (!%p26_p13, %s28_s30), %s588_s15 }
  0x17   : > { %s374_s6 = smul.u32 20, %s135_s5  ;;  %p30_p0 = scmp.ge.s32.totalorder %s784_s30, 2 }
  0x18   : > { %s356_s7 = sshll.u32 %s33_s4, 2  ;;  %s136_s1 = scalar_lea.sflag [#allocation3], %s135_s5 }
  0x19   : > { %s145_s17 = scalar_lea.hbm %s762_s0, %s356_s7  ;;  %s786_s30 = smov (%p30_p0, %s784_s30), 0 }
  0x1a   : > { %s146_s20 = sshll.u32 %s145_s17, 4  ;;  %s139_s22 = scalar_lea.vmem [#allocation2], %s374_s6  ;;  %s147_s20 = int_to_ptr.hbm [resolvable:$true] %s146_s20 }
  0x1b   : > { %s148_s23 = sshll.u32 %s139_s22, 4  ;;  %s351_s24 = sshll.u32 %s786_s30, 1  ;;  %s149_s23 = int_to_ptr.vmem [resolvable:$true] %s148_s23 }
  0x1c   : > { %s35_s26 = sadd.s32 %s351_s24, %s782_s29  ;;  %s595_s15 = smov 256  }
  0x1d   : > { %s36_s27 = ssub.s32 %s33_s4, %s35_s26  ;;  %s596_s8 = smov 64  }
  0x1e   : > { %p37_p1 = scmp.eq.s32.totalorder %s36_s27, 0  ;;  %s597_s7 = smov 4  }
  0x1f   : > { %389 = dma.hbm_to_vmem [thread:$0]  (!%p688_p12), %s147_s20, 320, %s149_s23, %s136_s1, %s595_s15, %s596_s8, %s597_s7  }
  0x20   : > { %s710_s3 = scalar_select %p37_p1, %s572_s11, %s39_s18  }
  0x21   : > { %160 = sbr.rel (%p677_p8) target bundleno = 323 (0x143), region = 28  ;;  %s162_s6 = sand.u32 (!%p677_p8), 1, %s568_s10  }
  0x22   : > { %s375_s9 = smul.u32 (!%p677_p8), 20, %s162_s6  ;;  %s163_s17 = scalar_lea.sflag (!%p677_p8), [#allocation3], %s162_s6 }
  0x24   : > { %s166_s22 = scalar_lea.vmem (!%p677_p8), [#allocation2], %s375_s9 }
  0x26   : > { %555 = dma.done.wait (%p669_p6), %s163_s17, 320  }
  0x27   : > { %557 = vsyncadd (%p669_p6), %s163_s17, 4294966976 }
  0x28   : > { %559 = dma.done.wait (%p658_p3), [#allocation5], 64  }
  0x29   : > { %561 = vsyncadd (%p658_p3), [#allocation5], 4294967232  ;;  %p194_p2 = scmp.lt.s32.totalorder %s580_s13, 1  ;;  %v204_v0 = vld [vmem:[%s166_s22 + $0x10] sm:$0x3]  ;;  %vm224_vm0 = vcmask 1041408  }
  0x2a   : > { %v214_v1 = vunpack.c.l.b16 %v204_v0  ;;  %v373_v4 = vld [vmem:[%s166_s22 + $0x8] sm:$0xff]  ;;  %v372_v5 = vld [vmem:[%s166_s22] sm:$0xff]  ;;  %vm220_vm1 = vcmask 293888   ;;  %p369_p3 = scmp.ne.s32.totalorder %s576_s12, 0 }
  0x2b   : > { %s788_s13 = smov (!%p194_p2, %s580_s13), 1  ;;  %v199_v6 = vld [vmem:[#allocation4] sm:$0xf] }
  0x2c   : > { %s359_s1 = sshll.u32 %s788_s13, 3  ;;  %v217_v2 = vpack.c.b16 %v214_v1, %v214_v1 }
  0x2d   : > { %s730_s25 = scalar_lea.vmem %s764_s2, %s359_s1 }
  0x2e   : > { %v226_v3 = vsel %vm224_vm0, %v217_v2, 0 }
  0x2f   : > { %233 = vmatpush.bf16.msra.mxu0 %v226_v3 }
  0x33   : > { %234 = vmatpush.bf16.msra.mxu0 %v373_v4 }
  0x37   : > { %235 = vmatpush.bf16.msra.mxu0 %v372_v5 }
  0x3a   : > { %368 = vmatmul.msk.bf16.vlgmr.msra.gmra.mxu0 %vm220_vm1, %v199_v6 }
  0xb7   : > { %v237_v7 = vpop.f32.mrf.mxu0 }
  0xbb   : > { %244 = sbr.rel (%p369_p3) target bundleno = 194 (0xc2), region = 40 }
  0xbf   : > { %v239_v8 = vpop.f32.mrf.mxu0 }
  0xc0   : > { %vm245_vm2 = vcmask 15360   ;;  %v598_v9 = vmov 0.0  }
  0xc1   : > { %246 = vst.msk [vmem:[%s730_s25] sm:$0xff] %vm245_vm2, %v598_v9 }
  0xc2 PF: > { %248 = vadd.xlane.f32.xlu0 %v237_v7  ;;  %v254_v10 = vmul.f32 %v237_v7, %v237_v7  ;;  %vm251_vm3 = vcmask 7168   ;;  %vm258_vm4 = vcmask 15368  }
  0xc8   : > { %v247_v11 = vld [vmem:[%s730_s25] sm:$0xff] }
  0xca   : > { %255 = vadd.xlane.f32.xlu0 %v254_v10 }
 0x135   : > { %v249_v12 = vpop.xlane.xlu0 %248 }
 0x136   : > { %v250_v13 = vadd.f32 %v249_v12, %v247_v11 }
 0x138   : > { %252 = vst.msk [vmem:[%s730_s25] sm:$0xff] %vm251_vm3, %v250_v13 }
 0x13d   : > { %v256_v14 = vpop.xlane.xlu0 %255 }
 0x13f   : > { %v253_v15 = vld [vmem:[%s730_s25] sm:$0xff] }
 0x140   : > { %v257_v16 = vadd.f32 %v256_v14, %v253_v15 }
 0x142   : > { %259 = vst.msk [vmem:[%s730_s25] sm:$0xff] %vm258_vm4, %v257_v16 }
 0x143 PF: > { %s16_s16 = sadd.s32 1, %s592_s16   ;;  %s774_s13 = sld [smem:[#allocation8_spill]] }
 0x144   : > { %p13_p4 = scmp.ge.s32.totalorder %s16_s16, 6   ;;  %s775_s9 = smov %s568_s10 }
 0x145   : > { %s776_s10 = smov %s572_s11  ;;  %s777_s11 = smov %s710_s3 }
 0x146   : > { %s778_s12 = smov %s584_s14  ;;  %s779_s14 = smov %s782_s29 }
 0x147   : > { %s780_s15 = smov %s786_s30  ;;  %15 = sbr.rel (!%p13_p4) target bundleno = 8 (0x8), region = 76 }
 0x14c   :  { %279 = vsyncpa [#allocation3], 1 }
 0x14d   :  { %281 = vsyncpa [#allocation3 + $0x1], 1 }
 0x14e   :  { %282 = vsyncpa [#allocation5], 1 }

</bundles_post_ra>
